<compile_context>
chip_gen: v5e
topology: v5e:2x2
jax: 0.10.0
libtpu: 0.0.40
codegen_flags: <defaults>
</compile_context>

<pallas_src>
import functools

import jax
import jax.numpy as jnp
import numpy as np
from jax.experimental import pallas as pl
from jax.experimental.pallas import tpu as pltpu

MU = 0.9


# ---------------------------------------------------------------------------
# Fused Pallas kernel: precompute + T propagation steps + head
# ---------------------------------------------------------------------------
def fused_gnn_kernel(mask_ref, maskT_ref, states0T_ref, xT_ref, xnT_ref,
                     dgT_ref, wxiT_ref, bxiT_ref, wrouT_ref, brouT_ref,
                     embT_ref, wleT_ref, wlsT_ref, blT_ref,
                     outT_ref, statesT_ref, *, s, T, mu):
    """All tensors are transposed so E / V lie on the lane (last) axis.

    mask    : (V, E)   one-hot of X_Node (mask[v, e] = 1 iff X_Node[e] == v)
    maskT   : (E, V)
    states0T: (s, V)   initial node states (transposed)
    xT      : (2*ln, E) concatenated [node_embed; neighbor_embed] transposed
    xnT     : (ln, E)  node embeds only (pre-split -> no in-kernel lane slice)
    dgT     : (1, E)   degree list
    """
    E = xT_ref.shape[1]

    # ---- step-invariant precompute (hoisted out of the T loop) ----
    # A^T, already scaled by mu/s/dg:  a3[i, j, e] == A[e, i, j]
    aT = jnp.tanh(jnp.dot(wxiT_ref[...], xT_ref[...],
                          preferred_element_type=jnp.float32) + bxiT_ref[...])
    aT = aT * ((mu / s) / dgT_ref[...])                        # (s*s, E)
    a3 = aT.reshape(s, s, E)                                   # (s, s, E)
    # rou^T = tanh(Wrou @ node_embeds^T + brou)
    rouT = jnp.tanh(jnp.dot(wrouT_ref[...], xnT_ref[...],
                            preferred_element_type=jnp.float32)
                    + brouT_ref[...])                          # (s, E)

    # ---- T propagation steps, states resident in VMEM (output ref) ----
    statesT_ref[...] = states0T_ref[...]
    for _ in range(T):  # T is a small static constant -> full unroll
        # gather:  H^T[j, e] = states[X_Node[e], j]
        HT = jnp.dot(statesT_ref[...], mask_ref[...],
                     preferred_element_type=jnp.float32)       # (s, E)
        # fused batched mat-vec: Hn^T[i, e] = sum_j A[e,i,j] * H[e,j] + rou[e,i]
        HnT = jnp.sum(a3 * HT[None, :, :], axis=1) + rouT      # (s, E)
        # scatter-add (AggrSum): states[v, j] = sum_{e: X_Node[e]==v} Hn[e, j]
        statesT_ref[...] = jnp.dot(HnT, maskT_ref[...],
                                   preferred_element_type=jnp.float32)  # (s, V)

    # ---- fused classification head: softmax([emb, states] @ Wl + bl) ----
    logitsT = (jnp.dot(wleT_ref[...], embT_ref[...],
                       preferred_element_type=jnp.float32)
               + jnp.dot(wlsT_ref[...], statesT_ref[...],
                         preferred_element_type=jnp.float32)
               + blT_ref[...])                                 # (3, V)
    m = jnp.max(logitsT, axis=0, keepdims=True)
    ex = jnp.exp(logitsT - m)
    outT_ref[...] = ex / jnp.sum(ex, axis=0, keepdims=True)


# ---------------------------------------------------------------------------
# Wrapper (plain-JAX glue + one pallas_call)
# ---------------------------------------------------------------------------
def ori_linear_gnn_forward(params, X_Node, X_Neis, dg_list, T):
    emb = params["embed"]                  # (V, ln)
    states0 = params["node_states"]        # (V, s)
    V, ln = emb.shape
    s = states0.shape[1]
    E = X_Node.shape[0]

    # Embedding gathers (glue), laid out transposed (features on sublanes).
    node_embeds = emb[X_Node]              # (E, ln)
    neis_embeds = emb[X_Neis]              # (E, ln)
    xT = jnp.concatenate([node_embeds, neis_embeds], axis=1).T   # (2*ln, E)
    xnT = node_embeds.T                                          # (ln, E)

    # One-hot mask of X_Node (matches AggrSum's mask construction).
    mask = (jnp.arange(V, dtype=jnp.int32)[:, None] ==
            X_Node[None, :]).astype(jnp.float32)                 # (V, E)
    maskT = mask.T                                               # (E, V)
    dgT = dg_list.reshape(1, E).astype(jnp.float32)              # (1, E)

    wxiT = params["Wxi"].T                                       # (s*s, 2*ln)
    bxiT = params["bxi"].reshape(s * s, 1)                       # (s*s, 1)
    wrouT = params["Wrou"].T                                     # (s, ln)
    brouT = params["brou"].reshape(s, 1)                         # (s, 1)
    wlT = params["Wl"].T                                         # (3, ln+s)
    wleT = wlT[:, :ln]                                           # (3, ln)
    wlsT = wlT[:, ln:]                                           # (3, s)
    blT = params["bl"].reshape(3, 1)                             # (3, 1)
    embT = emb.T                                                 # (ln, V)
    states0T = states0.T                                         # (s, V)

    inputs = (mask, maskT, states0T, xT, xnT, dgT,
              wxiT, bxiT, wrouT, brouT,
              embT, wleT, wlsT, blT)

    vmem_spec = pl.BlockSpec(memory_space=pltpu.MemorySpace.VMEM)
    outT, statesT = pl.pallas_call(
        functools.partial(fused_gnn_kernel, s=s, T=T, mu=MU),
        out_shape=(jax.ShapeDtypeStruct((3, V), jnp.float32),
                   jax.ShapeDtypeStruct((s, V), jnp.float32)),
        in_specs=[vmem_spec for _ in inputs],
        out_specs=(vmem_spec, vmem_spec),
        compiler_params=pltpu.CompilerParams(
            vmem_limit_bytes=16 * 1024 * 1024),
    )(*inputs)

    # Transpose back to the PyTorch-facing layout (glue).
    return outT.T, statesT.T


# ---------------------------------------------------------------------------
# Pure-JAX reference (mirrors the PyTorch forward exactly)
# ---------------------------------------------------------------------------
def ref_forward(params, X_Node, X_Neis, dg_list, T):
    emb = params["embed"]
    states = params["node_states"]
    V, ln = emb.shape
    s = states.shape[1]
    X = jnp.concatenate([emb[X_Node], emb[X_Neis]], axis=1)
    mask = (jnp.arange(V)[:, None] == X_Node[None, :]).astype(jnp.float32)
    for _ in range(T):
        H = states[X_Node]                                           # (E, s)
        xi = jnp.tanh(X @ params["Wxi"] + params["bxi"])             # (E, s*s)
        A = xi.reshape(-1, s, s) * MU / s / dg_list.reshape(-1, 1, 1)
        b = jnp.tanh(X[:, :ln] @ params["Wrou"] + params["brou"])    # (E, s)
        H = jnp.einsum("eij,ej->ei", A, H) + b
        states = mask @ H
    logits = jnp.concatenate([emb, states], axis=1) @ params["Wl"] + params["bl"]
    return jax.nn.softmax(logits, axis=1), states


# ---------------------------------------------------------------------------
# Main
# ---------------------------------------------------------------------------
if __name__ == "__main__":
    V, feat_dim, stat_dim, T = 16, 8, 8, 2   # node_num, feat_dim, stat_dim, T
    E = 32                                   # number of (node, neighbor) pairs

    key = jax.random.PRNGKey(0)
    ks = jax.random.split(key, 8)

    params = {
        "embed": jax.random.normal(ks[0], (V, feat_dim), jnp.float32) * 0.5,
        "node_states": jnp.zeros((V, stat_dim), jnp.float32),
        "Wxi": jax.random.normal(ks[1], (2 * feat_dim, stat_dim * stat_dim),
                                 jnp.float32) * 0.2,
        "bxi": jax.random.normal(ks[2], (1, stat_dim * stat_dim),
                                 jnp.float32) * 0.1,
        "Wrou": jax.random.normal(ks[3], (feat_dim, stat_dim),
                                  jnp.float32) * 0.2,
        "brou": jax.random.normal(ks[4], (1, stat_dim), jnp.float32) * 0.1,
        "Wl": jax.random.normal(ks[5], (feat_dim + stat_dim, 3),
                                jnp.float32) * 0.2,
        "bl": jax.random.normal(ks[6], (1, 3), jnp.float32) * 0.1,
    }

    X_Node = jax.random.randint(ks[7], (E,), 0, V, dtype=jnp.int32)
    X_Neis = jax.random.randint(jax.random.fold_in(key, 99), (E,), 0, V,
                                dtype=jnp.int32)
    dg_list = jax.random.uniform(jax.random.fold_in(key, 123), (E,),
                                 jnp.float32, 1.0, 4.0)

    out, states = ori_linear_gnn_forward(params, X_Node, X_Neis, dg_list, T)
    out = jax.block_until_ready(out)
    states = jax.block_until_ready(states)

    out_ref, states_ref = ref_forward(params, X_Node, X_Neis, dg_list, T)
    np.testing.assert_allclose(np.asarray(out), np.asarray(out_ref),
                               rtol=1e-5, atol=1e-5)
    np.testing.assert_allclose(np.asarray(states), np.asarray(states_ref),
                               rtol=1e-5, atol=1e-5)

    assert out.shape == (V, 3)
    print("KERNEL_OK")
</pallas_src>

<mosaic_0001>
module attributes {stable_mosaic.version = 11 : i64} {
  func.func @fused_gnn_kernel(%arg0: memref<16x32xf32, #tpu.memory_space<vmem>>, %arg1: memref<32x16xf32, #tpu.memory_space<vmem>>, %arg2: memref<8x16xf32, #tpu.memory_space<vmem>>, %arg3: memref<16x32xf32, #tpu.memory_space<vmem>>, %arg4: memref<8x32xf32, #tpu.memory_space<vmem>>, %arg5: memref<1x32xf32, #tpu.memory_space<vmem>>, %arg6: memref<64x16xf32, #tpu.memory_space<vmem>>, %arg7: memref<64x1xf32, #tpu.memory_space<vmem>>, %arg8: memref<8x8xf32, #tpu.memory_space<vmem>>, %arg9: memref<8x1xf32, #tpu.memory_space<vmem>>, %arg10: memref<8x16xf32, #tpu.memory_space<vmem>>, %arg11: memref<3x8xf32, #tpu.memory_space<vmem>>, %arg12: memref<3x8xf32, #tpu.memory_space<vmem>>, %arg13: memref<3x1xf32, #tpu.memory_space<vmem>>, %arg14: memref<3x16xf32, #tpu.memory_space<vmem>>, %arg15: memref<8x16xf32, #tpu.memory_space<vmem>>) attributes {dimension_semantics = [], scalar_prefetch = 0 : i64, scratch_operands = 0 : i64, tpu.core_type = #tpu.core_type<tc>} {
    %c0 = arith.constant 0 : index
    %c0_0 = arith.constant 0 : index
    %0 = vector.load %arg6[%c0, %c0_0] : memref<64x16xf32, #tpu.memory_space<vmem>>, vector<64x16xf32>
    %c0_1 = arith.constant 0 : index
    %c0_2 = arith.constant 0 : index
    %1 = vector.load %arg3[%c0_1, %c0_2] : memref<16x32xf32, #tpu.memory_space<vmem>>, vector<16x32xf32>
    %cst = arith.constant dense<0.000000e+00> : vector<64x32xf32>
    %2 = tpu.matmul %0, %1, %cst {dimension_numbers = #tpu.dot_dimension_numbers<[1], [0], [0], [1], [0, 0, 1, 1], [], []>} : vector<64x16xf32>, vector<16x32xf32>, vector<64x32xf32> -> vector<64x32xf32>
    %c0_3 = arith.constant 0 : index
    %c0_4 = arith.constant 0 : index
    %3 = vector.load %arg7[%c0_3, %c0_4] : memref<64x1xf32, #tpu.memory_space<vmem>>, vector<64x1xf32>
    %4 = vector.broadcast %3 : vector<64x1xf32> to vector<64x32xf32>
    %5 = arith.addf %2, %4 : vector<64x32xf32>
    %6 = math.tanh %5 : vector<64x32xf32>
    %c0_5 = arith.constant 0 : index
    %c0_6 = arith.constant 0 : index
    %7 = vector.load %arg5[%c0_5, %c0_6] : memref<1x32xf32, #tpu.memory_space<vmem>>, vector<1x32xf32>
    %cst_7 = arith.constant 1.125000e-01 : f32
    %8 = vector.broadcast %cst_7 : f32 to vector<1x32xf32>
    %9 = arith.divf %8, %7 : vector<1x32xf32>
    %10 = vector.broadcast %9 : vector<1x32xf32> to vector<64x32xf32>
    %11 = arith.mulf %6, %10 : vector<64x32xf32>
    %12 = vector.shape_cast %11 : vector<64x32xf32> to vector<8x8x32xf32>
    %c0_8 = arith.constant 0 : index
    %c0_9 = arith.constant 0 : index
    %13 = vector.load %arg8[%c0_8, %c0_9] : memref<8x8xf32, #tpu.memory_space<vmem>>, vector<8x8xf32>
    %c0_10 = arith.constant 0 : index
    %c0_11 = arith.constant 0 : index
    %14 = vector.load %arg4[%c0_10, %c0_11] : memref<8x32xf32, #tpu.memory_space<vmem>>, vector<8x32xf32>
    %cst_12 = arith.constant dense<0.000000e+00> : vector<8x32xf32>
    %15 = tpu.matmul %13, %14, %cst_12 {dimension_numbers = #tpu.dot_dimension_numbers<[1], [0], [0], [1], [0, 0, 1, 1], [], []>} : vector<8x8xf32>, vector<8x32xf32>, vector<8x32xf32> -> vector<8x32xf32>
    %c0_13 = arith.constant 0 : index
    %c0_14 = arith.constant 0 : index
    %16 = vector.load %arg9[%c0_13, %c0_14] : memref<8x1xf32, #tpu.memory_space<vmem>>, vector<8x1xf32>
    %17 = vector.broadcast %16 : vector<8x1xf32> to vector<8x32xf32>
    %18 = arith.addf %15, %17 : vector<8x32xf32>
    %19 = math.tanh %18 : vector<8x32xf32>
    %c0_15 = arith.constant 0 : index
    %c0_16 = arith.constant 0 : index
    %20 = vector.load %arg2[%c0_15, %c0_16] : memref<8x16xf32, #tpu.memory_space<vmem>>, vector<8x16xf32>
    %c0_17 = arith.constant 0 : index
    %c0_18 = arith.constant 0 : index
    %21 = vector.load %arg15[%c0_17, %c0_18] : memref<8x16xf32, #tpu.memory_space<vmem>>, vector<8x16xf32>
    tpu.vector_store %arg15[%c0_17, %c0_18], %20 {strides = array<i32>} : memref<8x16xf32, #tpu.memory_space<vmem>>, vector<8x16xf32>,
    %c0_19 = arith.constant 0 : index
    %c0_20 = arith.constant 0 : index
    %22 = vector.load %arg15[%c0_19, %c0_20] : memref<8x16xf32, #tpu.memory_space<vmem>>, vector<8x16xf32>
    %c0_21 = arith.constant 0 : index
    %c0_22 = arith.constant 0 : index
    %23 = vector.load %arg0[%c0_21, %c0_22] : memref<16x32xf32, #tpu.memory_space<vmem>>, vector<16x32xf32>
    %cst_23 = arith.constant dense<0.000000e+00> : vector<8x32xf32>
    %24 = tpu.matmul %22, %23, %cst_23 {dimension_numbers = #tpu.dot_dimension_numbers<[1], [0], [0], [1], [0, 0, 1, 1], [], []>} : vector<8x16xf32>, vector<16x32xf32>, vector<8x32xf32> -> vector<8x32xf32>
    %25 = vector.shape_cast %24 : vector<8x32xf32> to vector<1x8x32xf32>
    %26 = vector.broadcast %25 : vector<1x8x32xf32> to vector<8x8x32xf32>
    %27 = arith.mulf %12, %26 : vector<8x8x32xf32>
    %cst_24 = arith.constant dense<0.000000e+00> : vector<8x32xf32>
    %28 = vector.multi_reduction <add>, %27, %cst_24 [1] : vector<8x8x32xf32> to vector<8x32xf32>
    %29 = arith.addf %28, %19 : vector<8x32xf32>
    %c0_25 = arith.constant 0 : index
    %c0_26 = arith.constant 0 : index
    %30 = vector.load %arg1[%c0_25, %c0_26] : memref<32x16xf32, #tpu.memory_space<vmem>>, vector<32x16xf32>
    %cst_27 = arith.constant dense<0.000000e+00> : vector<8x16xf32>
    %31 = tpu.matmul %29, %30, %cst_27 {dimension_numbers = #tpu.dot_dimension_numbers<[1], [0], [0], [1], [0, 0, 1, 1], [], []>} : vector<8x32xf32>, vector<32x16xf32>, vector<8x16xf32> -> vector<8x16xf32>
    %c0_28 = arith.constant 0 : index
    %c0_29 = arith.constant 0 : index
    %32 = vector.load %arg15[%c0_28, %c0_29] : memref<8x16xf32, #tpu.memory_space<vmem>>, vector<8x16xf32>
    tpu.vector_store %arg15[%c0_28, %c0_29], %31 {strides = array<i32>} : memref<8x16xf32, #tpu.memory_space<vmem>>, vector<8x16xf32>,
    %c0_30 = arith.constant 0 : index
    %c0_31 = arith.constant 0 : index
    %33 = vector.load %arg15[%c0_30, %c0_31] : memref<8x16xf32, #tpu.memory_space<vmem>>, vector<8x16xf32>
    %c0_32 = arith.constant 0 : index
    %c0_33 = arith.constant 0 : index
    %34 = vector.load %arg0[%c0_32, %c0_33] : memref<16x32xf32, #tpu.memory_space<vmem>>, vector<16x32xf32>
    %cst_34 = arith.constant dense<0.000000e+00> : vector<8x32xf32>
    %35 = tpu.matmul %33, %34, %cst_34 {dimension_numbers = #tpu.dot_dimension_numbers<[1], [0], [0], [1], [0, 0, 1, 1], [], []>} : vector<8x16xf32>, vector<16x32xf32>, vector<8x32xf32> -> vector<8x32xf32>
    %36 = vector.shape_cast %35 : vector<8x32xf32> to vector<1x8x32xf32>
    %37 = vector.broadcast %36 : vector<1x8x32xf32> to vector<8x8x32xf32>
    %38 = arith.mulf %12, %37 : vector<8x8x32xf32>
    %cst_35 = arith.constant dense<0.000000e+00> : vector<8x32xf32>
    %39 = vector.multi_reduction <add>, %38, %cst_35 [1] : vector<8x8x32xf32> to vector<8x32xf32>
    %40 = arith.addf %39, %19 : vector<8x32xf32>
    %c0_36 = arith.constant 0 : index
    %c0_37 = arith.constant 0 : index
    %41 = vector.load %arg1[%c0_36, %c0_37] : memref<32x16xf32, #tpu.memory_space<vmem>>, vector<32x16xf32>
    %cst_38 = arith.constant dense<0.000000e+00> : vector<8x16xf32>
    %42 = tpu.matmul %40, %41, %cst_38 {dimension_numbers = #tpu.dot_dimension_numbers<[1], [0], [0], [1], [0, 0, 1, 1], [], []>} : vector<8x32xf32>, vector<32x16xf32>, vector<8x16xf32> -> vector<8x16xf32>
    %c0_39 = arith.constant 0 : index
    %c0_40 = arith.constant 0 : index
    %43 = vector.load %arg15[%c0_39, %c0_40] : memref<8x16xf32, #tpu.memory_space<vmem>>, vector<8x16xf32>
    tpu.vector_store %arg15[%c0_39, %c0_40], %42 {strides = array<i32>} : memref<8x16xf32, #tpu.memory_space<vmem>>, vector<8x16xf32>,
    %c0_41 = arith.constant 0 : index
    %c0_42 = arith.constant 0 : index
    %44 = vector.load %arg11[%c0_41, %c0_42] : memref<3x8xf32, #tpu.memory_space<vmem>>, vector<3x8xf32>
    %c0_43 = arith.constant 0 : index
    %c0_44 = arith.constant 0 : index
    %45 = vector.load %arg10[%c0_43, %c0_44] : memref<8x16xf32, #tpu.memory_space<vmem>>, vector<8x16xf32>
    %cst_45 = arith.constant dense<0.000000e+00> : vector<3x16xf32>
    %46 = tpu.matmul %44, %45, %cst_45 {dimension_numbers = #tpu.dot_dimension_numbers<[1], [0], [0], [1], [0, 0, 1, 1], [], []>} : vector<3x8xf32>, vector<8x16xf32>, vector<3x16xf32> -> vector<3x16xf32>
    %c0_46 = arith.constant 0 : index
    %c0_47 = arith.constant 0 : index
    %47 = vector.load %arg12[%c0_46, %c0_47] : memref<3x8xf32, #tpu.memory_space<vmem>>, vector<3x8xf32>
    %c0_48 = arith.constant 0 : index
    %c0_49 = arith.constant 0 : index
    %48 = vector.load %arg15[%c0_48, %c0_49] : memref<8x16xf32, #tpu.memory_space<vmem>>, vector<8x16xf32>
    %cst_50 = arith.constant dense<0.000000e+00> : vector<3x16xf32>
    %49 = tpu.matmul %47, %48, %cst_50 {dimension_numbers = #tpu.dot_dimension_numbers<[1], [0], [0], [1], [0, 0, 1, 1], [], []>} : vector<3x8xf32>, vector<8x16xf32>, vector<3x16xf32> -> vector<3x16xf32>
    %50 = arith.addf %46, %49 : vector<3x16xf32>
    %c0_51 = arith.constant 0 : index
    %c0_52 = arith.constant 0 : index
    %51 = vector.load %arg13[%c0_51, %c0_52] : memref<3x1xf32, #tpu.memory_space<vmem>>, vector<3x1xf32>
    %52 = vector.broadcast %51 : vector<3x1xf32> to vector<3x16xf32>
    %53 = arith.addf %50, %52 : vector<3x16xf32>
    %cst_53 = arith.constant dense<0xFF800000> : vector<16xf32>
    %54 = vector.multi_reduction <maximumf>, %53, %cst_53 [0] : vector<3x16xf32> to vector<16xf32>
    %55 = vector.shape_cast %54 : vector<16xf32> to vector<1x16xf32>
    %56 = vector.broadcast %55 : vector<1x16xf32> to vector<3x16xf32>
    %57 = arith.subf %53, %56 : vector<3x16xf32>
    %58 = math.exp %57 : vector<3x16xf32>
    %cst_54 = arith.constant dense<0.000000e+00> : vector<16xf32>
    %59 = vector.multi_reduction <add>, %58, %cst_54 [0] : vector<3x16xf32> to vector<16xf32>
    %60 = vector.shape_cast %59 : vector<16xf32> to vector<1x16xf32>
    %61 = vector.broadcast %60 : vector<1x16xf32> to vector<3x16xf32>
    %62 = arith.divf %58, %61 : vector<3x16xf32>
    %c0_55 = arith.constant 0 : index
    %c0_56 = arith.constant 0 : index
    %63 = vector.load %arg14[%c0_55, %c0_56] : memref<3x16xf32, #tpu.memory_space<vmem>>, vector<3x16xf32>
    tpu.vector_store %arg14[%c0_55, %c0_56], %62 {strides = array<i32>} : memref<3x16xf32, #tpu.memory_space<vmem>>, vector<3x16xf32>,
    return
  }
}

</mosaic_0001>

<bundles_post_ra>
// kernel: tpu_custom_call.1
= control target key start
LH: loop header
LB: loop body
LE: loop exit
PB: predicated region body
PF: predicated region fallthrough
CT: control target
= control target key end

     0   :  { %21 = vsyncpa [#allocation3], 0  ;;  %v787_v3 = vmov 0   ;;  %vm109_vm0 = vcmask 130048   ;;  %vm218_vm1 = vcmask 64512   ;;  %s1116_s0 = inlined_call_operand.vmem [shape: f32[16,32], index: 0, kind: input, shape index: {}]   ;;  %s1117_s1 = inlined_call_operand.vmem [shape: f32[32,16], index: 1, kind: input, shape index: {}]   ;;  %s1118_s2 = inlined_call_operand.vmem [shape: f32[8,16], index: 2, kind: input, shape index: {}]   ;;  %s1119_s3 = inlined_call_operand.vmem [shape: f32[16,32], index: 3, kind: input, shape index: {}]   ;;  %s1120_s4 = inlined_call_operand.vmem [shape: f32[8,32], index: 4, kind: input, shape index: {}]   ;;  %s1121_s5 = inlined_call_operand.vmem [shape: f32[1,32], index: 5, kind: input, shape index: {}]   ;;  %s1122_s6 = inlined_call_operand.vmem [shape: f32[64,16], index: 6, kind: input, shape index: {}]   ;;  %s1123_s7 = inlined_call_operand.vmem [shape: f32[64,1], index: 7, kind: input, shape index: {}]   ;;  %s1124_s8 = inlined_call_operand.vmem [shape: f32[8,8], index: 8, kind: input, shape index: {}]   ;;  %s1125_s9 = inlined_call_operand.vmem [shape: f32[8,1], index: 9, kind: input, shape index: {}]   ;;  %s1126_s10 = inlined_call_operand.vmem [shape: f32[8,16], index: 10, kind: input, shape index: {}]   ;;  %s1127_s11 = inlined_call_operand.vmem [shape: f32[3,8], index: 11, kind: input, shape index: {}]   ;;  %s1128_s12 = inlined_call_operand.vmem [shape: f32[3,8], index: 12, kind: input, shape index: {}]   ;;  %s1129_s13 = inlined_call_operand.vmem [shape: f32[3,1], index: 13, kind: input, shape index: {}]   ;;  %s1130_s14 = inlined_call_operand.hbm [shape: f32[3,16], index: 14, kind: output, shape index: {0}]   ;;  %s1131_s15 = inlined_call_operand.hbm [shape: f32[8,16], index: 15, kind: output, shape index: {1}]  }
   0x1   :  { %v60_v0 = vld [vmem:[%s1119_s3 + $0x8] sm:$0xff]  ;;  %v59_v2 = vld [vmem:[%s1119_s3] sm:$0xff]  ;;  %708 = vset.pattern.permute.xlu0 %v787_v3  ;;  %v57_v6 = vld [vmem:[%s1122_s6 + $0x30] sm:$0xff]  ;;  %709 = vset.pattern.permute.xlu1 %v787_v3 }
   0x2   :  { %v62_v1 = vld [vmem:[%s1123_s7 + $0x8] sm:$0xff]  ;;  %148 = vmatpush.msra.mxu0 %v60_v0  ;;  %701 = vmatpush.msra.mxu2 %v60_v0  ;;  %v51_v4 = vld [vmem:[%s1122_s6] sm:$0xff]  ;;  %v63_v14 = vld [vmem:[%s1123_s7 + $0x10] sm:$0xff] }
   0x3   :  { %702 = vmatpush.msra.mxu3 %v60_v0  ;;  %v55_v5 = vld [vmem:[%s1122_s6 + $0x20] sm:$0xff]  ;;  %76 = vperm.xlu0 %708, %v62_v1   ;;  %v247_v8 = vld [vmem:[%s1116_s0 + $0x8] sm:$0xff] }
   0x4   :  { %149 = vmatpush.msra.mxu0 %v59_v2  ;;  %703 = vmatpush.msra.mxu2 %v59_v2  ;;  %v61_v7 = vld [vmem:[%s1123_s7] sm:$0xff] }
   0x5   :  { %704 = vmatpush.msra.mxu3 %v59_v2  ;;  %686 = vmatmul.msk.f32.vlgmr.msra.gmra.mxu0 %vm109_vm0, %v51_v4  ;;  %v243_v9 = vld [vmem:[%s1118_s2] sm:$0xff] }
   0x6   :  { %690 = vmatmul.msk.f32.vlgmr.msra.gmra.mxu2 %vm109_vm0, %v55_v5  ;;  %v211_v10 = vld [vmem:[%s1120_s4] sm:$0xff]  ;;  %692 = vmatmul.msk.f32.vlgmr.msra.gmra.mxu3 %vm109_vm0, %v57_v6  ;;  %244 = vst.msk [vmem:[#allocation4] sm:$0xff] %vm109_vm0, %v243_v9 }
   0x7   :  { %v246_v11 = vld [vmem:[%s1116_s0] sm:$0xff]  ;;  %71 = vperm.xlu1 %709, %v61_v7   ;;  %265 = vmatpush.msrb.mxu2 %v247_v8 }
   0x8   :  { %v210_v12 = vld [vmem:[%s1124_s8] sm:$0xff]  ;;  %237 = vmatpush.msra.mxu1 %v211_v10  ;;  %710 = vset.pattern.permute.xlu2 %v787_v3 }
   0x9   :  { %v65_v13 = vld [vmem:[%s1123_s7 + $0x20] sm:$0xff] }
   0xa   :  { %22 = vsyncpa [#allocation5], 0  ;;  %266 = vmatpush.msrb.mxu2 %v246_v11  ;;  %694 = vmatmul.msk.f32.vlgmr.msra.gmra.mxu1 %vm218_vm1, %v210_v12  ;;  %v52_v15 = vld [vmem:[%s1122_s6 + $0x8] sm:$0xff]  ;;  %v58_v17 = vld [vmem:[%s1122_s6 + $0x38] sm:$0xff]  ;;  %vm279_vm6 = vcmask 261120   ;;  %vm373_vm7 = vcmask 1041409  }
   0xb   :  { %v56_v16 = vld [vmem:[%s1122_s6 + $0x28] sm:$0xff]  ;;  %91 = vperm.xlu2 %710, %v65_v13   ;;  %436 = vmatpush.msrb.mxu1 %v247_v8  ;;  %v64_v18 = vld [vmem:[%s1123_s7 + $0x18] sm:$0xff]  ;;  %v67_v20 = vld [vmem:[%s1123_s7 + $0x30] sm:$0xff]  ;;  %vm376_vm8 = vcmask 1042434   ;;  %vm379_vm9 = vcmask 1043459   ;;  %vm382_vm10 = vcmask 1044484  }
   0xc   :  { %81 = vperm.xlu0 %708, %v63_v14   ;;  %v66_v19 = vld [vmem:[%s1123_s7 + $0x28] sm:$0xff]  ;;  %v53_v21 = vld [vmem:[%s1122_s6 + $0x10] sm:$0xff]  ;;  %v68_v23 = vld [vmem:[%s1123_s7 + $0x38] sm:$0xff]  ;;  %vm385_vm11 = vcmask 1045509   ;;  %vm388_vm12 = vcmask 1046534   ;;  %vm391_vm13 = vcmask 1047559  }
   0xd   :  { %437 = vmatpush.msrb.mxu1 %v246_v11  ;;  %687 = vmatmul.msk.f32.gmra.mxu0 %vm109_vm0, %v52_v15  ;;  %v245_v22 = vld [vmem:[#allocation4] sm:$0xff]  ;;  %v613_v25 = vld [vmem:[%s1129_s13] sm:$0x7]  ;;  %v54_v26 = vld [vmem:[%s1122_s6 + $0x18] sm:$0xff]  ;;  %s788_s22 = smov [#allocation4]   ;;  %vm620_vm14 = vcmask 124928  }
   0xe   :  { %691 = vmatmul.msk.f32.gmra.mxu2 %vm109_vm0, %v56_v16  ;;  %693 = vmatmul.msk.f32.gmra.mxu3 %vm109_vm0, %v58_v17  ;;  %v212_v24 = vld [vmem:[%s1125_s9] sm:$0xff]  ;;  %v363_v5 = vld [vmem:[%s1117_s1 + $0x18] sm:$0xff]  ;;  %v362_v6 = vld [vmem:[%s1117_s1 + $0x10] sm:$0xff]  ;;  %s661_s26 = sshll.u32 %s1130_s14, 4  ;;  %s662_s26 = int_to_ptr.hbm [resolvable:$true] %s661_s26 }
   0xf   :  { %86 = vperm.xlu1 %709, %v64_v18   ;;  %v183_v27 = vld [vmem:[%s1121_s5] sm:$0x1]  ;;  %407 = vmatpush.msrb.mxu3 %v363_v5  ;;  %v361_v9 = vld [vmem:[%s1117_s1 + $0x8] sm:$0xff] }
  0x10   :  { %711 = vrcp.f32 %v183_v27  ;;  %vm189_vm2 = vweird.f32 %v183_v27  ;;  %v195_v36 = vand.u32 2147483648, %v183_v27  ;;  %v193_v38 = vand.u32 2147483647, %v183_v27  ;;  %554 = vmatpush.msra.mxu2 %v363_v5  ;;  %v360_v15 = vld [vmem:[%s1117_s1] sm:$0xff] }
  0x11   :  { %408 = vmatpush.msrb.mxu3 %v362_v6 }
  0x12   :  { %v196_v42 = vor.u32 1.1754944e-38, %v195_v36  ;;  %vm194_vm5 = vcmp.eq.f32.partialorder %v193_v38, 8.507059e+37  ;;  %555 = vmatpush.msra.mxu2 %v362_v6 }
  0x13   :  { %96 = vperm.xlu2 %710, %v66_v19   ;;  %409 = vmatpush.msrb.mxu3 %v361_v9 }
  0x14   :  { %101 = vperm.xlu0 %708, %v67_v20   ;;  %556 = vmatpush.msra.mxu2 %v361_v9 }
  0x15   :  { %688 = vmatmul.msk.f32.gmra.mxu0 %vm109_vm0, %v53_v21  ;;  %410 = vmatpush.msrb.mxu3 %v360_v15 }
  0x16   :  { %695 = vmatmul.msk.f32.vlgmr.msrb.gmra.mxu2 %vm109_vm0, %v245_v22  ;;  %v712_v29 = vpop.eup %711 }
  0x17   :  { %106 = vperm.xlu1 %709, %v68_v23   ;;  %v185_v30 = vmul.f32 %v712_v29, %v183_v27  ;;  %vm190_vm3 = vweird.f32 %v712_v29  ;;  %557 = vmatpush.msra.mxu2 %v360_v15 }
  0x18   :  { %vm959_vm4 = vmor %vm189_vm2, %vm190_vm3 }
  0x19   :  { %v186_v32 = vsub.f32 1.0, %v185_v30 }
  0x1b   :  { %215 = vperm.xlu2 %710, %v212_v24   ;;  %v187_v34 = vmul.f32 %v712_v29, %v186_v32 }
  0x1c   :  { %616 = vperm.xlu0 %708, %v613_v25  }
  0x1d   :  { %689 = vmatmul.msk.f32.gmra.mxu0 %vm109_vm0, %v54_v26  ;;  %v188_v37 = vadd.f32 %v712_v29, %v187_v34 }
  0x1f   :  { %v192_v45 = vsel %vm959_vm4, %v712_v29, %v188_v37 }
  0x20   :  { %v197_v52 = vsel %vm194_vm5, %v196_v42, %v192_v45 }
  0x21   :  { %v198_v53 = vmul.f32 0.1125, %v197_v52 }
  0x23   :  { %v967_v0 = vperm.slane %v198_v53, 0 }
  0x65   :  { %v92_v40 = vpop.permute.xlu2 %91 }
  0x6d   :  { %v97_v54 = vpop.permute.xlu2 %96 }
  0x75   :  { %v77_v28 = vpop.permute.xlu0 %76  ;;  %v216_v36 = vpop.permute.xlu2 %215 }
  0x79   :  { %v72_v31 = vpop.permute.xlu1 %71 }
  0x7e   :  { %v82_v33 = vpop.permute.xlu0 %81 }
  0x81   :  { %v963_v41 = vpop.permute.xlu1 %86 }
  0x82   :  { %v151_v35 = vpop.f32.mrf.mxu0 }
  0x83   :  { %v152_v44 = vadd.f32 %v151_v35, %v72_v31 }
  0x86   :  { %v102_v46 = vpop.permute.xlu0 %101 }
  0x87   :  { %v239_v35 = vpop.f32.mrf.mxu1 }
  0x89   :  { %v163_v43 = vpop.f32.mrf.mxu2  ;;  %v169_v48 = vpop.f32.mrf.mxu3 }
  0x8a   :  { %v164_v47 = vadd.f32 %v163_v43, %v92_v40  ;;  %v170_v49 = vadd.f32 %v169_v48, %v102_v46  ;;  %v154_v50 = vpop.f32.mrf.mxu0  ;;  %v107_v57 = vpop.permute.xlu1 %106 }
  0x8b   :  { %v155_v51 = vadd.f32 %v154_v50, %v77_v28 }
  0x8c   :  { %713 = vtanh.f32 %v164_v47 }
  0x8d   :  { %715 = vtanh.f32 %v170_v49 }
  0x8e   :  { %717 = vtanh.f32 %v152_v44  ;;  %v240_v44 = vadd.f32 %v239_v35, %v216_v36 }
  0x8f   :  { %719 = vtanh.f32 %v155_v51 }
  0x91   :  { %v166_v55 = vpop.f32.mrf.mxu2  ;;  %v172_v59 = vpop.f32.mrf.mxu3 }
  0x92   :  { %v714_v56 = vpop.eup %713  ;;  %v167_v58 = vadd.f32 %v166_v55, %v97_v54  ;;  %v173_v61 = vadd.f32 %v172_v59, %v107_v57  ;;  %v157_v62 = vpop.f32.mrf.mxu0 }
  0x93   :  { %v716_v60 = vpop.eup %715  ;;  %v158_v1 = vadd.f32 %v157_v62, %v82_v33  ;;  %v970_v3 = vmul.f32 %v714_v56, %v967_v0 }
  0x94   :  { %v718_v63 = vpop.eup %717  ;;  %721 = vtanh.f32 %v167_v58  ;;  %v973_v4 = vmul.f32 %v716_v60, %v967_v0 }
  0x95   :  { %v720_v2 = vpop.eup %719  ;;  %723 = vtanh.f32 %v173_v61  ;;  %v982_v7 = vmul.f32 %v718_v63, %v967_v0 }
  0x96   :  { %725 = vtanh.f32 %v158_v1  ;;  %v985_v8 = vmul.f32 %v720_v2, %v967_v0 }
  0x99   :  { %v268_v10 = vpop.f32.mrf.mxu2 }
  0x9a   :  { %v722_v11 = vpop.eup %721  ;;  %v271_v12 = vmul.f32 %v268_v10, %v982_v7  ;;  %v272_v13 = vmul.f32 %v268_v10, %v985_v8  ;;  %v275_v14 = vmul.f32 %v268_v10, %v970_v3  ;;  %v277_v16 = vmul.f32 %v268_v10, %v973_v4  ;;  %v160_v19 = vpop.f32.mrf.mxu0 }
  0x9b   :  { %v724_v17 = vpop.eup %723  ;;  %v998_v18 = vmul.f32 %v722_v11, %v967_v0  ;;  %v161_v28 = vadd.f32 %v160_v19, %v963_v41 }
  0x9c   :  { %v726_v20 = vpop.eup %725  ;;  %v1001_v21 = vmul.f32 %v724_v17, %v967_v0  ;;  %v287_v22 = vsel %vm279_vm6, %v272_v13, 0.0  ;;  %v308_v23 = vsel %vm279_vm6, %v275_v14, 0.0  ;;  %v280_v26 = vsel %vm279_vm6, %v271_v12, 0.0 }
  0x9d   :  { %v1006_v24 = vmul.f32 %v726_v20, %v967_v0  ;;  %v276_v25 = vmul.f32 %v268_v10, %v998_v18  ;;  %v288_v27 = vrot.slane %v287_v22, 4  ;;  %v322_v30 = vsel %vm279_vm6, %v277_v16, 0.0 }
  0x9e   :  { %v278_v29 = vmul.f32 %v268_v10, %v1001_v21  ;;  %v309_v33 = vrot.slane %v308_v23, 4  ;;  %v281_v37 = vrot.slane %v280_v26, 4  ;;  %727 = vtanh.f32 %v161_v28 }
  0x9f   :  { %v273_v31 = vmul.f32 %v268_v10, %v1006_v24  ;;  %v289_v32 = vadd.f32 %v288_v27, %v287_v22  ;;  %v315_v34 = vsel %vm279_vm6, %v276_v25, 0.0  ;;  %v323_v40 = vrot.slane %v322_v30, 4 }
  0xa0   :  { %v316_v38 = vrot.slane %v315_v34, 4  ;;  %v329_v41 = vsel %vm279_vm6, %v278_v29, 0.0  ;;  %v310_v45 = vadd.f32 %v309_v33, %v308_v23  ;;  %v282_v47 = vadd.f32 %v281_v37, %v280_v26 }
  0xa1   :  { %v294_v39 = vsel %vm279_vm6, %v273_v31, 0.0  ;;  %v290_v42 = vrot.slane %v289_v32, 2  ;;  %v330_v46 = vrot.slane %v329_v41, 4  ;;  %v324_v50 = vadd.f32 %v323_v40, %v322_v30 }
  0xa2   :  { %v295_v43 = vrot.slane %v294_v39, 4  ;;  %v317_v49 = vadd.f32 %v316_v38, %v315_v34  ;;  %729 = vtanh.f32 %v240_v44  ;;  %v311_v56 = vrot.slane %v310_v45, 2 }
  0xa3   :  { %v291_v52 = vadd.f32 %v290_v42, %v289_v32  ;;  %v331_v54 = vadd.f32 %v330_v46, %v329_v41  ;;  %v283_v57 = vrot.slane %v282_v47, 2  ;;  %v325_v61 = vrot.slane %v324_v50, 2 }
  0xa4   :  { %v296_v48 = vadd.f32 %v295_v43, %v294_v39  ;;  %v728_v51 = vpop.eup %727  ;;  %v318_v59 = vrot.slane %v317_v49, 2  ;;  %v312_v5 = vadd.f32 %v311_v56, %v310_v45 }
  0xa5   :  { %v1018_v55 = vmul.f32 %v728_v51, %v967_v0  ;;  %v292_v62 = vrot.slane %v291_v52, 1  ;;  %v332_v63 = vrot.slane %v331_v54, 2  ;;  %v284_v6 = vadd.f32 %v283_v57, %v282_v47 }
  0xa6   :  { %v297_v53 = vrot.slane %v296_v48, 2  ;;  %v319_v11 = vadd.f32 %v318_v59, %v317_v49  ;;  %v326_v0 = vadd.f32 %v325_v61, %v324_v50  ;;  %v313_v17 = vrot.slane %v312_v5, 1 }
  0xa7   :  { %v274_v60 = vmul.f32 %v268_v10, %v1018_v55  ;;  %v293_v14 = vadd.f32 %v292_v62, %v291_v52  ;;  %v333_v15 = vadd.f32 %v332_v63, %v331_v54  ;;  %v285_v10 = vrot.slane %v284_v6, 1 }
  0xa8   :  { %v298_v58 = vadd.f32 %v297_v53, %v296_v48  ;;  %v1022_v12 = vpop.eup %729  ;;  %v320_v20 = vrot.slane %v319_v11, 1  ;;  %v327_v23 = vrot.slane %v326_v0, 1  ;;  %v314_v29 = vadd.f32 %v313_v17, %v312_v5 }
  0xa9   :  { %v301_v1 = vsel %vm279_vm6, %v274_v60, 0.0  ;;  %v337_v22 = vrot.slane %v1022_v12, 1  ;;  %v338_v25 = vrot.slane %v1022_v12, 2  ;;  %v334_v27 = vrot.slane %v333_v15, 1 }
  0xaa   :  { %v299_v2 = vrot.slane %v298_v58, 1  ;;  %v302_v9 = vrot.slane %v301_v1, 4  ;;  %v286_v32 = vadd.f32 %v285_v10, %v284_v6  ;;  %v321_v33 = vadd.f32 %v320_v20, %v319_v11 }
  0xab   :  { %v353_v28 = vadd.f32 %v337_v22, %v293_v14  ;;  %v328_v34 = vadd.f32 %v327_v23, %v326_v0  ;;  %v339_v35 = vrot.slane %v1022_v12, 3  ;;  %v340_v36 = vrot.slane %v1022_v12, 4 }
  0xac   :  { %v303_v13 = vadd.f32 %v302_v9, %v301_v1  ;;  %v300_v16 = vadd.f32 %v299_v2, %v298_v58  ;;  %v335_v38 = vadd.f32 %v334_v27, %v333_v15  ;;  %v341_v39 = vrot.slane %v1022_v12, 5 }
  0xad   :  { %v372_v40 = vrot.slane %v353_v28, 7  ;;  %v342_v41 = vrot.slane %v1022_v12, 6  ;;  %v343_v42 = vrot.slane %v1022_v12, 7  ;;  %v356_v43 = vadd.f32 %v340_v36, %v314_v29 }
  0xae   :  { %v304_v19 = vrot.slane %v303_v13, 2  ;;  %v354_v30 = vadd.f32 %v338_v25, %v300_v16  ;;  %v352_v45 = vadd.f32 %v1022_v12, %v286_v32  ;;  %v357_v47 = vadd.f32 %v341_v39, %v321_v33 }
  0xaf   :  { %v358_v48 = vadd.f32 %v342_v41, %v328_v34  ;;  %v359_v49 = vadd.f32 %v343_v42, %v335_v38  ;;  %v381_v53 = vrot.slane %v356_v43, 4 }
  0xb0   :  { %v305_v26 = vadd.f32 %v304_v19, %v303_v13  ;;  %v375_v44 = vrot.slane %v354_v30, 6  ;;  %v374_v50 = vsel %vm373_vm7, %v372_v40, %v352_v45  ;;  %v384_v56 = vrot.slane %v357_v47, 3 }
  0xb1   :  { %v387_v58 = vrot.slane %v358_v48, 2  ;;  %v390_v60 = vrot.slane %v359_v49, 1 }
  0xb2   :  { %v306_v31 = vrot.slane %v305_v26, 1  ;;  %v377_v52 = vsel %vm376_vm8, %v375_v44, %v374_v50 }
  0xb4   :  { %v307_v37 = vadd.f32 %v306_v31, %v305_v26 }
  0xb6   :  { %v355_v46 = vadd.f32 %v339_v35, %v307_v37 }
  0xb8   :  { %v378_v51 = vrot.slane %v355_v46, 5 }
  0xba   :  { %v380_v54 = vsel %vm379_vm9, %v378_v51, %v377_v52 }
  0xbb   :  { %v383_v57 = vsel %vm382_vm10, %v381_v53, %v380_v54 }
  0xbc   :  { %v386_v59 = vsel %vm385_vm11, %v384_v56, %v383_v57 }
  0xbd   :  { %v389_v61 = vsel %vm388_vm12, %v387_v58, %v386_v59 }
  0xbe   :  { %v392_v62 = vsel %vm391_vm13, %v390_v60, %v389_v61 }
  0xbf   :  { %696 = vmatmul.msk.f32.vlgmr.msrb.gmra.mxu3 %vm279_vm6, %v392_v62 }
 0x142   :  { %v412_v63 = vpop.f32.mrf.mxu3 }
 0x143   :  { %415 = vst.msk [vmem:[#allocation4] sm:$0xff] %vm109_vm0, %v412_v63 }
 0x14a   :  { %v416_v1 = vld [vmem:[#allocation4] sm:$0xff] }
 0x14b   :  { %697 = vmatmul.msk.f32.vlgmr.msrb.gmra.mxu1 %vm109_vm0, %v416_v1 }
 0x1c8   :  { %v439_v2 = vpop.f32.mrf.mxu1 }
 0x1c9   :  { %v442_v5 = vmul.f32 %v439_v2, %v982_v7  ;;  %v443_v6 = vmul.f32 %v439_v2, %v985_v8  ;;  %v444_v9 = vmul.f32 %v439_v2, %v1006_v24  ;;  %v445_v11 = vmul.f32 %v439_v2, %v1018_v55 }
 0x1ca   :  { %v446_v0 = vmul.f32 %v439_v2, %v970_v3  ;;  %v447_v13 = vmul.f32 %v439_v2, %v998_v18  ;;  %v448_v14 = vmul.f32 %v439_v2, %v973_v4  ;;  %v449_v15 = vmul.f32 %v439_v2, %v1001_v21 }
 0x1cb   :  { %v450_v16 = vsel %vm279_vm6, %v442_v5, 0.0  ;;  %v457_v17 = vsel %vm279_vm6, %v443_v6, 0.0  ;;  %v464_v7 = vsel %vm279_vm6, %v444_v9, 0.0  ;;  %v471_v8 = vsel %vm279_vm6, %v445_v11, 0.0 }
 0x1cc   :  { %v451_v19 = vrot.slane %v450_v16, 4  ;;  %v458_v24 = vrot.slane %v457_v17, 4  ;;  %v465_v10 = vrot.slane %v464_v7, 4  ;;  %v472_v55 = vrot.slane %v471_v8, 4 }
 0x1cd   :  { %v478_v3 = vsel %vm279_vm6, %v446_v0, 0.0  ;;  %v485_v18 = vsel %vm279_vm6, %v447_v13, 0.0  ;;  %v492_v4 = vsel %vm279_vm6, %v448_v14, 0.0  ;;  %v499_v21 = vsel %vm279_vm6, %v449_v15, 0.0 }
 0x1ce   :  { %v452_v20 = vadd.f32 %v451_v19, %v450_v16  ;;  %v459_v23 = vadd.f32 %v458_v24, %v457_v17  ;;  %v466_v26 = vadd.f32 %v465_v10, %v464_v7  ;;  %v473_v27 = vadd.f32 %v472_v55, %v471_v8 }
 0x1cf   :  { %v479_v28 = vrot.slane %v478_v3, 4  ;;  %v486_v29 = vrot.slane %v485_v18, 4  ;;  %v493_v30 = vrot.slane %v492_v4, 4  ;;  %v500_v31 = vrot.slane %v499_v21, 4 }
 0x1d0   :  { %v453_v32 = vrot.slane %v452_v20, 2  ;;  %v460_v33 = vrot.slane %v459_v23, 2  ;;  %v467_v34 = vrot.slane %v466_v26, 2  ;;  %v474_v37 = vrot.slane %v473_v27, 2 }
 0x1d1   :  { %v480_v38 = vadd.f32 %v479_v28, %v478_v3  ;;  %v487_v40 = vadd.f32 %v486_v29, %v485_v18  ;;  %v494_v43 = vadd.f32 %v493_v30, %v492_v4  ;;  %v501_v44 = vadd.f32 %v500_v31, %v499_v21  ;;  %v565_v29 = vld [vmem:[%s1128_s12] sm:$0x7]  ;;  %s789_s12 = smov [#allocation2]  }
 0x1d2   :  { %v454_v45 = vadd.f32 %v453_v32, %v452_v20  ;;  %v461_v46 = vadd.f32 %v460_v33, %v459_v23  ;;  %v468_v47 = vadd.f32 %v467_v34, %v466_v26  ;;  %v475_v48 = vadd.f32 %v474_v37, %v473_v27  ;;  %v563_v27 = vld [vmem:[%s1127_s11] sm:$0x7]  ;;  %s672_s11 = sshll.u32 %s1131_s15, 4  ;;  %v617_v34 = vpop.permute.xlu0 %616  ;;  %s659_s15 = sshll.u32 %s789_s12, 4  ;;  %s673_s11 = int_to_ptr.hbm [resolvable:$true] %s672_s11  ;;  %s660_s15 = int_to_ptr.vmem [resolvable:$true] %s659_s15 }
 0x1d3   :  { %v481_v49 = vrot.slane %v480_v38, 2  ;;  %v488_v50 = vrot.slane %v487_v40, 2  ;;  %v495_v51 = vrot.slane %v494_v43, 2  ;;  %v502_v52 = vrot.slane %v501_v44, 2 }
 0x1d4   :  { %v455_v53 = vrot.slane %v454_v45, 1  ;;  %v462_v54 = vrot.slane %v461_v46, 1  ;;  %v469_v56 = vrot.slane %v468_v47, 1  ;;  %v476_v57 = vrot.slane %v475_v48, 1 }
 0x1d5   :  { %v482_v58 = vadd.f32 %v481_v49, %v480_v38  ;;  %v489_v59 = vadd.f32 %v488_v50, %v487_v40  ;;  %v496_v60 = vadd.f32 %v495_v51, %v494_v43  ;;  %v503_v61 = vadd.f32 %v502_v52, %v501_v44 }
 0x1d6   :  { %v456_v62 = vadd.f32 %v455_v53, %v454_v45  ;;  %v463_v63 = vadd.f32 %v462_v54, %v461_v46  ;;  %v470_v1 = vadd.f32 %v469_v56, %v468_v47  ;;  %v477_v2 = vadd.f32 %v476_v57, %v475_v48 }
 0x1d7   :  { %v483_v5 = vrot.slane %v482_v58, 1  ;;  %v490_v6 = vrot.slane %v489_v59, 1  ;;  %v497_v9 = vrot.slane %v496_v60, 1  ;;  %v504_v11 = vrot.slane %v503_v61, 1 }
 0x1d8   :  { %v507_v0 = vadd.f32 %v463_v63, %v337_v22  ;;  %v508_v13 = vadd.f32 %v470_v1, %v338_v25  ;;  %v509_v14 = vadd.f32 %v477_v2, %v339_v35  ;;  %v506_v8 = vadd.f32 %v1022_v12, %v456_v62 }
 0x1d9   :  { %v484_v15 = vadd.f32 %v483_v5, %v482_v58  ;;  %v491_v16 = vadd.f32 %v490_v6, %v489_v59  ;;  %v498_v17 = vadd.f32 %v497_v9, %v496_v60  ;;  %v505_v7 = vadd.f32 %v504_v11, %v503_v61 }
 0x1da   :  { %v526_v19 = vrot.slane %v507_v0, 7  ;;  %v528_v24 = vrot.slane %v508_v13, 6  ;;  %v530_v3 = vrot.slane %v509_v14, 5 }
 0x1db   :  { %v510_v10 = vadd.f32 %v484_v15, %v340_v36  ;;  %v511_v22 = vadd.f32 %v491_v16, %v341_v39  ;;  %v512_v25 = vadd.f32 %v498_v17, %v342_v41  ;;  %v513_v35 = vadd.f32 %v505_v7, %v343_v42  ;;  %v564_v42 = vld [vmem:[%s1126_s10] sm:$0xff]  ;;  %s670_s10 = sshll.u32 %s788_s22, 4  ;;  %s671_s10 = int_to_ptr.vmem [resolvable:$true] %s670_s10 }
 0x1dc   :  { %v527_v55 = vsel %vm373_vm7, %v526_v19, %v506_v8  ;;  %608 = vmatpush.msra.mxu1 %v564_v42 }
 0x1dd   :  { %v529_v18 = vsel %vm376_vm8, %v528_v24, %v527_v55  ;;  %v532_v4 = vrot.slane %v510_v10, 4  ;;  %v534_v20 = vrot.slane %v511_v22, 3  ;;  %v536_v23 = vrot.slane %v512_v25, 2  ;;  %700 = vmatmul.msk.f32.vlgmr.msra.gmra.mxu1 %vm218_vm1, %v563_v27 }
 0x1de   :  { %v531_v21 = vsel %vm379_vm9, %v530_v3, %v529_v18  ;;  %v538_v26 = vrot.slane %v513_v35, 1 }
 0x1df   :  { %v533_v36 = vsel %vm382_vm10, %v532_v4, %v531_v21 }
 0x1e0   :  { %v535_v39 = vsel %vm385_vm11, %v534_v20, %v533_v36 }
 0x1e1   :  { %v537_v41 = vsel %vm388_vm12, %v536_v23, %v535_v39 }
 0x1e2   :  { %v539_v12 = vsel %vm391_vm13, %v538_v26, %v537_v41 }
 0x1e3   :  { %698 = vmatmul.msk.f32.vlgmr.msra.gmra.mxu2 %vm279_vm6, %v539_v12 }
 0x25a   :  { %v610_v31 = vpop.f32.mrf.mxu1 }
 0x266   :  { %v559_v28 = vpop.f32.mrf.mxu2 }
 0x267   :  { %562 = vst.msk [vmem:[#allocation4] sm:$0xff] %vm109_vm0, %v559_v28 }
 0x268   :  { %675 = dma.vmem_to_hbm [thread:$0]  %s671_s10, 128, %s673_s11, [#allocation5]  }
 0x26e   :  { %v566_v30 = vld [vmem:[#allocation4] sm:$0xff] }
 0x26f   :  { %585 = vmatpush.msra.mxu3 %v566_v30 }
 0x270   :  { %699 = vmatmul.msk.f32.vlgmr.msra.gmra.mxu3 %vm218_vm1, %v565_v29 }
 0x2f3   :  { %v587_v32 = vpop.f32.mrf.mxu3 }
 0x2f4   :  { %v611_v33 = vadd.f32 %v610_v31, %v587_v32 }
 0x2f6   :  { %v619_v37 = vadd.f32 %v617_v34, %v611_v33 }
 0x2f8   :  { %v621_v38 = vsel %vm620_vm14, %v619_v37, -inf }
 0x2f9   :  { %v622_v40 = vrot.slane %v621_v38, 4 }
 0x2fb   :  { %v623_v43 = vmax.f32 %v621_v38, %v622_v40 }
 0x2fd   :  { %v624_v44 = vrot.slane %v623_v43, 2 }
 0x2ff   :  { %v625_v45 = vmax.f32 %v623_v43, %v624_v44 }
 0x301   :  { %v626_v46 = vrot.slane %v625_v45, 1 }
 0x303   :  { %v627_v47 = vmax.f32 %v625_v45, %v626_v46 }
 0x305   :  { %v628_v48 = vsub.f32 %v619_v37, %v627_v47 }
 0x307   :  { %v629_v49 = vmul.f32 1.442695, %v628_v48 }
 0x309   :  { %731 = vpow2.f32 %v629_v49 }
 0x30f   :  { %v732_v50 = vpop.eup %731 }
 0x310   :  { %v631_v51 = vsel %vm620_vm14, %v732_v50, 0.0 }
 0x311   :  { %v632_v52 = vrot.slane %v631_v51, 4 }
 0x313   :  { %v633_v53 = vadd.f32 %v632_v52, %v631_v51 }
 0x315   :  { %v634_v54 = vrot.slane %v633_v53, 2 }
 0x317   :  { %v635_v56 = vadd.f32 %v634_v54, %v633_v53 }
 0x319   :  { %v636_v57 = vrot.slane %v635_v56, 1 }
 0x31b   :  { %v637_v58 = vadd.f32 %v636_v57, %v635_v56 }
 0x31d   :  { %733 = vrcp.f32 %v637_v58  ;;  %v649_v62 = vand.u32 2147483648, %v637_v58  ;;  %v647_v1 = vand.u32 2147483647, %v637_v58  ;;  %vm643_vm0 = vweird.f32 %v637_v58 }
 0x31f   :  { %v650_v5 = vor.u32 1.1754944e-38, %v649_v62  ;;  %vm648_vm2 = vcmp.eq.f32.partialorder %v647_v1, 8.507059e+37 }
 0x323   :  { %v734_v59 = vpop.eup %733 }
 0x324   :  { %v639_v60 = vmul.f32 %v734_v59, %v637_v58  ;;  %vm644_vm15 = vweird.f32 %v734_v59 }
 0x325   :  { %vm645_vm1 = vmor %vm643_vm0, %vm644_vm15 }
 0x326   :  { %v640_v61 = vsub.f32 1.0, %v639_v60 }
 0x328   :  { %v641_v63 = vmul.f32 %v734_v59, %v640_v61 }
 0x32a   :  { %v642_v2 = vadd.f32 %v734_v59, %v641_v63 }
 0x32c   :  { %v646_v6 = vsel %vm645_vm1, %v734_v59, %v642_v2 }
 0x32d   :  { %v651_v9 = vsel %vm648_vm2, %v650_v5, %v646_v6 }
 0x32e   :  { %v652_v11 = vmul.f32 %v732_v50, %v651_v9 }
 0x330   :  { %653 = vst.msk [vmem:[#allocation2] sm:$0x7] %vm620_vm14, %v652_v11 }
 0x331   :  { %664 = dma.vmem_to_hbm [thread:$0]  %s660_s15, 64, %s662_s26, [#allocation3]  }
 0x332   :  { %783 = dma.done.wait [#allocation3], 64  }
 0x333   :  { %784 = vsyncadd [#allocation3], 4294967232 }
 0x334   :  { %785 = dma.done.wait [#allocation5], 128  }
 0x335   :  { %786 = vsyncadd [#allocation5], 4294967168 }
 0x336   :  { %684 = vsyncpa [#allocation3], 1 }
 0x337   :  { %685 = vsyncpa [#allocation5], 1 }

</bundles_post_ra>
